<compile_context>
chip_gen: v6e
topology: v6e:2x2x1
jax: 0.10.0
libtpu: 0.0.40
codegen_flags: <defaults>
</compile_context>

<pallas_src>
import functools
import math

import jax
import jax.numpy as jnp
from jax import lax
from jax.experimental import pallas as pl
from jax.experimental.pallas import tpu as pltpu

N_CENSUS_FEATURES = 6
N_DIMS_COUNTY_ENCODING = 10
AE_LATENT_DIM = 8

INPUT_DIM = N_CENSUS_FEATURES + N_DIMS_COUNTY_ENCODING   # 16
HIDDEN_DIM = AE_LATENT_DIM                                # 8

FOLD = 8                        # samples folded per row: 8 * 16 features = 128 lanes
LANES = FOLD * INPUT_DIM        # 128
HID_LANES = FOLD * HIDDEN_DIM   # 64

# Packed parameter slab layout: 6 weight chunks of 128 sublane rows, then one
# 8-row chunk of biases / masks.  All zero-padded.
W_CHUNK = 128
BIAS_ROW0 = 6 * W_CHUNK         # 768
SLAB_ROWS = BIAS_ROW0 + 8       # 776 (multiple of 8)


def _cdiv(a, b):
    return -(-a // b)


def _round_up(n, m):
    return _cdiv(n, m) * m


# ---------------------------------------------------------------------------
# Kernel
# ---------------------------------------------------------------------------
def features_ae_kernel(x_ref, p_ref, hid_ref, out_ref):
    """x_ref:   (tr, 128) folded input  (8 samples x 16 features per row)
       p_ref:   (776, 128) packed block-diagonal weights + biases + head mask
       hid_ref: (tr, 64)  folded hidden (8 samples x 8 dims  per row)
       out_ref: (tr, 128) folded output (8 samples x 16 dims per row)"""

    def w(k, rows=W_CHUNK, cols=LANES):
        return p_ref[pl.ds(k * W_CHUNK, rows), pl.ds(0, cols)]

    def b(r, cols=LANES):
        return p_ref[pl.ds(BIAS_ROW0 + r, 1), pl.ds(0, cols)]

    def dot(a, wm):
        return jnp.dot(a, wm, preferred_element_type=jnp.float32)

    def sigmoid(z):                       # 1 EUP op instead of exp + divide
        return 0.5 * jnp.tanh(0.5 * z) + 0.5

    x = x_ref[...].astype(jnp.float32)

    # ---- encoder: Linear -> ReLU, x3 ---------------------------------------
    h = jnp.maximum(dot(x, w(0)) + b(0), 0.0)                          # (tr,128)
    h = jnp.maximum(dot(h, w(1)) + b(1), 0.0)                          # (tr,128)
    hid = jnp.maximum(dot(h, w(2, cols=HID_LANES)) + b(2, cols=HID_LANES),
                      0.0)                                             # (tr, 64)
    hid_ref[...] = hid.astype(hid_ref.dtype)   # == batch-major (bt, 8) in HBM

    # ---- decoder_bone: Linear -> Sigmoid, x2 --------------------------------
    d = sigmoid(dot(hid, w(3, rows=HID_LANES)) + b(3))                 # (tr,128)
    d = sigmoid(dot(d, w(4)) + b(4))                                   # (tr,128)

    # ---- fused head: per sample lanes 0..9 cfips (sigmoid), 10..15 census ---
    z = dot(d, w(5)) + b(5)                                            # (tr,128)
    cfips_mask = b(6)                          # 1.0 on cfips lanes, 0.0 census
    out = z + cfips_mask * (sigmoid(z) - z)
    out_ref[...] = out.astype(out_ref.dtype)   # == batch-major (bt, 16) in HBM


# ---------------------------------------------------------------------------
# Parameters (torch nn.Linear layout: W (out, in), b (out,))
# ---------------------------------------------------------------------------
_LAYER_DEFS = [
    ("e1", 12, INPUT_DIM),
    ("e2", 12, 12),
    ("e3", HIDDEN_DIM, 12),
    ("d1", 12, HIDDEN_DIM),
    ("d2", 12, 12),
    ("cf", N_DIMS_COUNTY_ENCODING, 12),
    ("cs", N_CENSUS_FEATURES, 12),
]


def init_params(key):
    """Deterministic init mirroring torch nn.Linear (bounded by 1/sqrt(fan_in))."""
    params = {}
    keys = jax.random.split(key, 2 * len(_LAYER_DEFS))
    for idx, (name, out_d, in_d) in enumerate(_LAYER_DEFS):
        bound = 1.0 / math.sqrt(in_d)
        params["w" + name] = jax.random.uniform(
            keys[2 * idx], (out_d, in_d), jnp.float32, -bound, bound)
        params["b" + name] = jax.random.uniform(
            keys[2 * idx + 1], (out_d,), jnp.float32, -bound, bound)
    return params


def pack_params(params):
    """Fold torch-layout weights into block-diagonal lane-dense matrices and
    tiled biases, packed into one zero-padded (776, 128) f32 slab."""
    eye = jnp.eye(FOLD, dtype=jnp.float32)

    def wfold(wt, out_pad, in_pad):
        o, i = wt.shape
        wp = jnp.zeros((out_pad, in_pad), jnp.float32).at[:o, :i].set(wt)
        return jnp.kron(eye, wp.T)             # (FOLD*in_pad, FOLD*out_pad)

    def bfold(bv, out_pad):
        bp = jnp.zeros((out_pad,), jnp.float32).at[:bv.shape[0]].set(bv)
        return jnp.tile(bp, FOLD)

    whead = jnp.concatenate([params["wcf"], params["wcs"]], axis=0)    # (16,12)
    bhead = jnp.concatenate([params["bcf"], params["bcs"]], axis=0)    # (16,)

    weights = [
        wfold(params["we1"], INPUT_DIM, INPUT_DIM),    # (128, 128)
        wfold(params["we2"], INPUT_DIM, INPUT_DIM),    # (128, 128)
        wfold(params["we3"], HIDDEN_DIM, INPUT_DIM),   # (128,  64)
        wfold(params["wd1"], INPUT_DIM, HIDDEN_DIM),   # ( 64, 128)
        wfold(params["wd2"], INPUT_DIM, INPUT_DIM),    # (128, 128)
        wfold(whead,         INPUT_DIM, INPUT_DIM),    # (128, 128)
    ]
    bias_rows = [
        bfold(params["be1"], INPUT_DIM),
        bfold(params["be2"], INPUT_DIM),
        bfold(params["be3"], HIDDEN_DIM),              # (64,)
        bfold(params["bd1"], INPUT_DIM),
        bfold(params["bd2"], INPUT_DIM),
        bfold(bhead,         INPUT_DIM),
        bfold(jnp.ones((N_DIMS_COUNTY_ENCODING,), jnp.float32), INPUT_DIM),
    ]

    slab = jnp.zeros((SLAB_ROWS, LANES), jnp.float32)
    for k, wm in enumerate(weights):
        r, c = wm.shape
        slab = slab.at[k * W_CHUNK:k * W_CHUNK + r, :c].set(wm)
    for r, bv in enumerate(bias_rows):
        slab = slab.at[BIAS_ROW0 + r, :bv.shape[0]].set(bv)
    return slab


# ---------------------------------------------------------------------------
# Forward wrapper
# ---------------------------------------------------------------------------
@functools.partial(jax.jit, static_argnames=("batch_tile",))
def features_ae_forward(x, params, batch_tile=16384):
    """Returns (hidden_state (B, 8), output (B, 16)) like the torch module.

    batch_tile = samples per grid step.  Suggested ~8192 (v5e), ~16384 (v6e),
    ~32768 (v7x); it is auto-clamped so the grid keeps >= ~4 steps.
    """
    B = x.shape[0]
    if x.shape[1] != INPUT_DIM:
        raise ValueError(f"expected input dim {INPUT_DIM}, got {x.shape[1]}")
    slab = pack_params(params)

    # Fold 8 samples per 128-lane row.
    rows = _cdiv(B, FOLD)
    tr_req = _round_up(max(batch_tile, FOLD * FOLD), FOLD * FOLD) // FOLD
    tr_cap = _round_up(_cdiv(rows, 4), FOLD)        # keep >= ~4 grid steps
    tr = max(FOLD, min(tr_req, tr_cap))
    rows_p = _round_up(rows, tr)
    Bp = rows_p * FOLD
    if Bp != B:
        # TODO(synk): for very large ragged batches pad only the tail tile (or
        # pre-pad upstream) to avoid this extra full copy of x.
        x = jnp.pad(x, ((0, Bp - B), (0, 0)))
    xf = x.reshape(rows_p, LANES)                   # free row-major fold
    grid = (rows_p // tr,)

    block_bytes = tr * (LANES + HID_LANES + LANES) * 4
    vmem_bytes = 2 * block_bytes + 2 * SLAB_ROWS * LANES * 4 + (2 << 20)

    cost = pl.CostEstimate(
        flops=int(rows_p * (2 * LANES * (4 * LANES + HID_LANES)
                            + 2 * HID_LANES * LANES)),
        transcendentals=int(rows_p * 3 * LANES),
        bytes_accessed=int(4 * (rows_p * (2 * LANES + HID_LANES)
                                + SLAB_ROWS * LANES)),
    )

    hid_f, out_f = pl.pallas_call(
        features_ae_kernel,
        out_shape=(
            jax.ShapeDtypeStruct((rows_p, HID_LANES), jnp.float32),
            jax.ShapeDtypeStruct((rows_p, LANES), jnp.float32),
        ),
        grid_spec=pltpu.PrefetchScalarGridSpec(
            num_scalar_prefetch=0,
            grid=grid,
            in_specs=[
                pl.BlockSpec((tr, LANES), lambda i: (i, 0)),
                # one packed parameter slab, constant block -> DMA'd once
                pl.BlockSpec((SLAB_ROWS, LANES), lambda i: (0, 0)),
            ],
            out_specs=[
                pl.BlockSpec((tr, HID_LANES), lambda i: (i, 0)),
                pl.BlockSpec((tr, LANES), lambda i: (i, 0)),
            ],
        ),
        compiler_params=pltpu.CompilerParams(
            dimension_semantics=("parallel",),      # batch tiles -> v7x TCs
            vmem_limit_bytes=int(min(max(vmem_bytes, 16 << 20), 64 << 20)),
        ),
        cost_estimate=cost,
    )(xf, slab)

    # Free refolds: outputs are already batch-major, no transposes needed.
    hidden = hid_f.reshape(Bp, HIDDEN_DIM)
    out = out_f.reshape(Bp, INPUT_DIM)
    if Bp != B:
        hidden = hidden[:B]
        out = out[:B]
    return hidden, out


# ---------------------------------------------------------------------------
# Pure-JAX reference matching the PyTorch forward exactly.
# ---------------------------------------------------------------------------
def reference_forward(x, params):
    def lin(v, w, b):
        return v @ w.T + b

    h = jax.nn.relu(lin(x, params["we1"], params["be1"]))
    h = jax.nn.relu(lin(h, params["we2"], params["be2"]))
    hidden = jax.nn.relu(lin(h, params["we3"], params["be3"]))

    d = jax.nn.sigmoid(lin(hidden, params["wd1"], params["bd1"]))
    d = jax.nn.sigmoid(lin(d, params["wd2"], params["bd2"]))

    out_census = lin(d, params["wcs"], params["bcs"])
    out_cfips = jax.nn.sigmoid(lin(d, params["wcf"], params["bcf"]))
    out = jnp.concatenate([out_cfips, out_census], axis=1)
    return hidden, out


if __name__ == "__main__":
    key = jax.random.PRNGKey(0)
    k_params, k_x = jax.random.split(key)

    params = init_params(k_params)

    # Ragged batch (not a multiple of 8 nor of the tile) to exercise the
    # padding path; the tile auto-clamp still gives a multi-step grid.
    B = 300
    x = jax.random.normal(k_x, (B, INPUT_DIM), dtype=jnp.float32)

    hidden, out = features_ae_forward(x, params)
    jax.block_until_ready((hidden, out))

    ref_hidden, ref_out = reference_forward(x, params)
    assert hidden.shape == (B, HIDDEN_DIM)
    assert out.shape == (B, INPUT_DIM)
    assert jnp.allclose(hidden, ref_hidden, atol=1e-4, rtol=1e-4)
    assert jnp.allclose(out, ref_out, atol=1e-4, rtol=1e-4)

    print("KERNEL_OK")
</pallas_src>

<mosaic_0001>
module attributes {stable_mosaic.version = 11 : i64} {
  func.func @features_ae_kernel(%arg0: i32, %arg1: memref<16x128xf32, #tpu.memory_space<vmem>>, %arg2: memref<776x128xf32, #tpu.memory_space<vmem>>, %arg3: memref<16x64xf32, #tpu.memory_space<vmem>>, %arg4: memref<16x128xf32, #tpu.memory_space<vmem>>) attributes {dimension_semantics = [#tpu.dimension_semantics<parallel>], iteration_bounds = array<i64: 3>, scalar_prefetch = 0 : i64, scratch_operands = 0 : i64, tpu.core_type = #tpu.core_type<tc>, window_params = [{transform_indices = @transform_0, window_bounds = array<i64: 16, 128>}, {pipeline_mode = #tpu.pipeline_mode<synchronous>, transform_indices = @transform_1, window_bounds = array<i64: 776, 128>}, {transform_indices = @transform_2, window_bounds = array<i64: 16, 64>}, {transform_indices = @transform_3, window_bounds = array<i64: 16, 128>}]} {
    %c0 = arith.constant 0 : index
    %c0_0 = arith.constant 0 : index
    %0 = vector.load %arg1[%c0, %c0_0] : memref<16x128xf32, #tpu.memory_space<vmem>>, vector<16x128xf32>
    %c0_1 = arith.constant 0 : index
    %c0_2 = arith.constant 0 : index
    %1 = vector.load %arg2[%c0_1, %c0_2] : memref<776x128xf32, #tpu.memory_space<vmem>>, vector<128x128xf32>
    %cst = arith.constant dense<0.000000e+00> : vector<16x128xf32>
    %2 = tpu.matmul %0, %1, %cst {dimension_numbers = #tpu.dot_dimension_numbers<[1], [0], [0], [1], [0, 0, 1, 1], [], []>} : vector<16x128xf32>, vector<128x128xf32>, vector<16x128xf32> -> vector<16x128xf32>
    %c768 = arith.constant 768 : index
    %c0_3 = arith.constant 0 : index
    %3 = vector.load %arg2[%c768, %c0_3] : memref<776x128xf32, #tpu.memory_space<vmem>>, vector<1x128xf32>
    %4 = vector.broadcast %3 : vector<1x128xf32> to vector<16x128xf32>
    %5 = arith.addf %2, %4 : vector<16x128xf32>
    %cst_4 = arith.constant 0.000000e+00 : f32
    %6 = vector.broadcast %cst_4 : f32 to vector<16x128xf32>
    %7 = arith.maximumf %5, %6 : vector<16x128xf32>
    %c128 = arith.constant 128 : index
    %c0_5 = arith.constant 0 : index
    %8 = vector.load %arg2[%c128, %c0_5] : memref<776x128xf32, #tpu.memory_space<vmem>>, vector<128x128xf32>
    %cst_6 = arith.constant dense<0.000000e+00> : vector<16x128xf32>
    %9 = tpu.matmul %7, %8, %cst_6 {dimension_numbers = #tpu.dot_dimension_numbers<[1], [0], [0], [1], [0, 0, 1, 1], [], []>} : vector<16x128xf32>, vector<128x128xf32>, vector<16x128xf32> -> vector<16x128xf32>
    %c769 = arith.constant 769 : index
    %c0_7 = arith.constant 0 : index
    %10 = vector.load %arg2[%c769, %c0_7] : memref<776x128xf32, #tpu.memory_space<vmem>>, vector<1x128xf32>
    %11 = vector.broadcast %10 : vector<1x128xf32> to vector<16x128xf32>
    %12 = arith.addf %9, %11 : vector<16x128xf32>
    %cst_8 = arith.constant 0.000000e+00 : f32
    %13 = vector.broadcast %cst_8 : f32 to vector<16x128xf32>
    %14 = arith.maximumf %12, %13 : vector<16x128xf32>
    %c256 = arith.constant 256 : index
    %c0_9 = arith.constant 0 : index
    %15 = vector.load %arg2[%c256, %c0_9] : memref<776x128xf32, #tpu.memory_space<vmem>>, vector<128x64xf32>
    %cst_10 = arith.constant dense<0.000000e+00> : vector<16x64xf32>
    %16 = tpu.matmul %14, %15, %cst_10 {dimension_numbers = #tpu.dot_dimension_numbers<[1], [0], [0], [1], [0, 0, 1, 1], [], []>} : vector<16x128xf32>, vector<128x64xf32>, vector<16x64xf32> -> vector<16x64xf32>
    %c770 = arith.constant 770 : index
    %c0_11 = arith.constant 0 : index
    %17 = vector.load %arg2[%c770, %c0_11] : memref<776x128xf32, #tpu.memory_space<vmem>>, vector<1x64xf32>
    %18 = vector.broadcast %17 : vector<1x64xf32> to vector<16x64xf32>
    %19 = arith.addf %16, %18 : vector<16x64xf32>
    %cst_12 = arith.constant 0.000000e+00 : f32
    %20 = vector.broadcast %cst_12 : f32 to vector<16x64xf32>
    %21 = arith.maximumf %19, %20 : vector<16x64xf32>
    %c0_13 = arith.constant 0 : index
    %c0_14 = arith.constant 0 : index
    %22 = vector.load %arg3[%c0_13, %c0_14] : memref<16x64xf32, #tpu.memory_space<vmem>>, vector<16x64xf32>
    tpu.vector_store %arg3[%c0_13, %c0_14], %21 {strides = array<i32>} : memref<16x64xf32, #tpu.memory_space<vmem>>, vector<16x64xf32>,
    %c384 = arith.constant 384 : index
    %c0_15 = arith.constant 0 : index
    %23 = vector.load %arg2[%c384, %c0_15] : memref<776x128xf32, #tpu.memory_space<vmem>>, vector<64x128xf32>
    %cst_16 = arith.constant dense<0.000000e+00> : vector<16x128xf32>
    %24 = tpu.matmul %21, %23, %cst_16 {dimension_numbers = #tpu.dot_dimension_numbers<[1], [0], [0], [1], [0, 0, 1, 1], [], []>} : vector<16x64xf32>, vector<64x128xf32>, vector<16x128xf32> -> vector<16x128xf32>
    %c771 = arith.constant 771 : index
    %c0_17 = arith.constant 0 : index
    %25 = vector.load %arg2[%c771, %c0_17] : memref<776x128xf32, #tpu.memory_space<vmem>>, vector<1x128xf32>
    %26 = vector.broadcast %25 : vector<1x128xf32> to vector<16x128xf32>
    %27 = arith.addf %24, %26 : vector<16x128xf32>
    %cst_18 = arith.constant 5.000000e-01 : f32
    %28 = vector.broadcast %cst_18 : f32 to vector<16x128xf32>
    %29 = arith.mulf %28, %27 : vector<16x128xf32>
    %30 = math.tanh %29 : vector<16x128xf32>
    %cst_19 = arith.constant 5.000000e-01 : f32
    %31 = vector.broadcast %cst_19 : f32 to vector<16x128xf32>
    %32 = arith.mulf %31, %30 : vector<16x128xf32>
    %cst_20 = arith.constant 5.000000e-01 : f32
    %33 = vector.broadcast %cst_20 : f32 to vector<16x128xf32>
    %34 = arith.addf %32, %33 : vector<16x128xf32>
    %c512 = arith.constant 512 : index
    %c0_21 = arith.constant 0 : index
    %35 = vector.load %arg2[%c512, %c0_21] : memref<776x128xf32, #tpu.memory_space<vmem>>, vector<128x128xf32>
    %cst_22 = arith.constant dense<0.000000e+00> : vector<16x128xf32>
    %36 = tpu.matmul %34, %35, %cst_22 {dimension_numbers = #tpu.dot_dimension_numbers<[1], [0], [0], [1], [0, 0, 1, 1], [], []>} : vector<16x128xf32>, vector<128x128xf32>, vector<16x128xf32> -> vector<16x128xf32>
    %c772 = arith.constant 772 : index
    %c0_23 = arith.constant 0 : index
    %37 = vector.load %arg2[%c772, %c0_23] : memref<776x128xf32, #tpu.memory_space<vmem>>, vector<1x128xf32>
    %38 = vector.broadcast %37 : vector<1x128xf32> to vector<16x128xf32>
    %39 = arith.addf %36, %38 : vector<16x128xf32>
    %cst_24 = arith.constant 5.000000e-01 : f32
    %40 = vector.broadcast %cst_24 : f32 to vector<16x128xf32>
    %41 = arith.mulf %40, %39 : vector<16x128xf32>
    %42 = math.tanh %41 : vector<16x128xf32>
    %cst_25 = arith.constant 5.000000e-01 : f32
    %43 = vector.broadcast %cst_25 : f32 to vector<16x128xf32>
    %44 = arith.mulf %43, %42 : vector<16x128xf32>
    %cst_26 = arith.constant 5.000000e-01 : f32
    %45 = vector.broadcast %cst_26 : f32 to vector<16x128xf32>
    %46 = arith.addf %44, %45 : vector<16x128xf32>
    %c640 = arith.constant 640 : index
    %c0_27 = arith.constant 0 : index
    %47 = vector.load %arg2[%c640, %c0_27] : memref<776x128xf32, #tpu.memory_space<vmem>>, vector<128x128xf32>
    %cst_28 = arith.constant dense<0.000000e+00> : vector<16x128xf32>
    %48 = tpu.matmul %46, %47, %cst_28 {dimension_numbers = #tpu.dot_dimension_numbers<[1], [0], [0], [1], [0, 0, 1, 1], [], []>} : vector<16x128xf32>, vector<128x128xf32>, vector<16x128xf32> -> vector<16x128xf32>
    %c773 = arith.constant 773 : index
    %c0_29 = arith.constant 0 : index
    %49 = vector.load %arg2[%c773, %c0_29] : memref<776x128xf32, #tpu.memory_space<vmem>>, vector<1x128xf32>
    %50 = vector.broadcast %49 : vector<1x128xf32> to vector<16x128xf32>
    %51 = arith.addf %48, %50 : vector<16x128xf32>
    %c774 = arith.constant 774 : index
    %c0_30 = arith.constant 0 : index
    %52 = vector.load %arg2[%c774, %c0_30] : memref<776x128xf32, #tpu.memory_space<vmem>>, vector<1x128xf32>
    %cst_31 = arith.constant 5.000000e-01 : f32
    %53 = vector.broadcast %cst_31 : f32 to vector<16x128xf32>
    %54 = arith.mulf %53, %51 : vector<16x128xf32>
    %55 = math.tanh %54 : vector<16x128xf32>
    %cst_32 = arith.constant 5.000000e-01 : f32
    %56 = vector.broadcast %cst_32 : f32 to vector<16x128xf32>
    %57 = arith.mulf %56, %55 : vector<16x128xf32>
    %cst_33 = arith.constant 5.000000e-01 : f32
    %58 = vector.broadcast %cst_33 : f32 to vector<16x128xf32>
    %59 = arith.addf %57, %58 : vector<16x128xf32>
    %60 = arith.subf %59, %51 : vector<16x128xf32>
    %61 = vector.broadcast %52 : vector<1x128xf32> to vector<16x128xf32>
    %62 = arith.mulf %61, %60 : vector<16x128xf32>
    %63 = arith.addf %51, %62 : vector<16x128xf32>
    %c0_34 = arith.constant 0 : index
    %c0_35 = arith.constant 0 : index
    %64 = vector.load %arg4[%c0_34, %c0_35] : memref<16x128xf32, #tpu.memory_space<vmem>>, vector<16x128xf32>
    tpu.vector_store %arg4[%c0_34, %c0_35], %63 {strides = array<i32>} : memref<16x128xf32, #tpu.memory_space<vmem>>, vector<16x128xf32>,
    return
  }
  func.func @transform_0(%arg0: i32) -> (i32, i32) {
    %c0_i32 = arith.constant 0 : i32
    %c0_i32_0 = arith.constant 0 : i32
    return %arg0, %c0_i32 : i32, i32
  }
  func.func @transform_1(%arg0: i32) -> (i32, i32) {
    %c0_i32 = arith.constant 0 : i32
    %c0_i32_0 = arith.constant 0 : i32
    %c0_i32_1 = arith.constant 0 : i32
    return %c0_i32, %c0_i32_0 : i32, i32
  }
  func.func @transform_2(%arg0: i32) -> (i32, i32) {
    %c0_i32 = arith.constant 0 : i32
    %c0_i32_0 = arith.constant 0 : i32
    return %arg0, %c0_i32 : i32, i32
  }
  func.func @transform_3(%arg0: i32) -> (i32, i32) {
    %c0_i32 = arith.constant 0 : i32
    %c0_i32_0 = arith.constant 0 : i32
    return %arg0, %c0_i32 : i32, i32
  }
}

</mosaic_0001>

<bundles_post_ra>
// kernel: tile.38
= control target key start
LH: loop header
LB: loop body
LE: loop exit
PB: predicated region body
PF: predicated region fallthrough
CT: control target
= control target key end

     0   :  { %s22_s0 = inlined_call_operand.vmem [shape: f32[16], index: 0, kind: input, shape index: {}]   ;;  %s23_s1 = inlined_call_operand.vmem [shape: f32[8,16], index: 1, kind: output, shape index: {}]  }
   0x1   :  { %v4_v0 = vld [vmem:[%s22_s0] ss:$0 sm:$0xff] }
   0x2   :  { %5 = vst [vmem:[%s23_s1] sm:$0xff] %v4_v0 }

// kernel: tile.48
= control target key start
LH: loop header
LB: loop body
LE: loop exit
PB: predicated region body
PF: predicated region fallthrough
CT: control target
= control target key end

     0   :  { %s22_s0 = inlined_call_operand.vmem [shape: f32[8], index: 0, kind: input, shape index: {}]   ;;  %s23_s1 = inlined_call_operand.vmem [shape: f32[8,8], index: 1, kind: output, shape index: {}]  }
   0x1   :  { %v4_v0 = vld [vmem:[%s22_s0] ss:$0 sm:$0xff] }
   0x2   :  { %5 = vst [vmem:[%s23_s1] sm:$0xff] %v4_v0 }

// kernel: features_ae_forward.1
= control target key start
LH: loop header
LB: loop body
LE: loop exit
PB: predicated region body
PF: predicated region fallthrough
CT: control target
= control target key end

     0   :  { %s1264_s12 = smov 0   ;;  %s1578_s0 = inlined_call_operand.vmem [shape: f32[48,128], index: 0, kind: input, shape index: {}]   ;;  %s1579_s1 = inlined_call_operand.vmem [shape: f32[776,128], index: 1, kind: input, shape index: {}]   ;;  %s1580_s2 = inlined_call_operand.vmem [shape: f32[48,64], index: 2, kind: output, shape index: {0}]   ;;  %s1581_s3 = inlined_call_operand.vmem [shape: f32[48,128], index: 3, kind: output, shape index: {1}]  }
   0x1 LB: > { %s900_s13 = sadd.s32 4294967295, %s1242_s12   ;;  %p904_p0 = scmp.ge.s32.totalorder %s1242_s12, 1  ;;  %s1242_s12 = sphi %s1264_s12, %s14_s12  }
   0x2   : > { %p141_p1 = scmp.lt.s32.totalorder %s1242_s12, 4 }
   0x4   : > { %p142_p2 = pnand %p904_p0, %p141_p1 }
   0x5   : > { %s905_s18 = sshll.u32 (!%p142_p2), %s900_s13, 1 }
   0x6   : > { %145 = sbr.rel (%p142_p2) target bundleno = 1304 (0x518), region = 28  ;;  %p171_p3 = scmp.lt.s32.totalorder (!%p142_p2), %s905_s18, 5 }
   0xb   : > { %v205_v0 = vld [vmem:[%s1579_s1 + $0x78] sm:$0xff]  ;;  %v204_v1 = vld [vmem:[%s1579_s1 + $0x70] sm:$0xff]  ;;  %v203_v2 = vld [vmem:[%s1579_s1 + $0x68] sm:$0xff]  ;;  %s1583_s18 = smov (!%p171_p3, %s905_s18), 5  ;;  %vm484_vm0 = vcmask 523264  }
   0xc   : > { %1022 = vmatprep.subr.mxu0 %v205_v0  ;;  %v202_v3 = vld [vmem:[%s1579_s1 + $0x60] sm:$0xff]  ;;  %s1284_s23 = sshll.u32 %s1583_s18, 3  ;;  %v303_v4 = vld [vmem:[%s1579_s1 + $0xf8] sm:$0xff]  ;;  %v302_v6 = vld [vmem:[%s1579_s1 + $0xf0] sm:$0xff] }
   0xd   : > { %1023 = vmatpush3.msra.mxu0 %v205_v0  ;;  %v201_v5 = vld [vmem:[%s1579_s1 + $0x58] sm:$0xff]  ;;  %s1296_s30 = scalar_lea.vmem %s1578_s0, %s1284_s23  ;;  %1057 = vmatprep.subr.mxu1 %v303_v4  ;;  %v200_v8 = vld [vmem:[%s1579_s1 + $0x50] sm:$0xff]  ;;  %v301_v9 = vld [vmem:[%s1579_s1 + $0xe8] sm:$0xff]  ;;  %s180_s16 = scalar_lea.vmem %s1580_s2, %s1284_s23 }
   0xe   : > { %1024 = vmatprep.subr.mxu0 %v204_v1  ;;  %v188_v7 = vld [vmem:[%s1296_s30] sm:$0xff]  ;;  %1058 = vmatpush3.msra.mxu1 %v303_v4  ;;  %v199_v10 = vld [vmem:[%s1579_s1 + $0x48] sm:$0xff]  ;;  %v299_v13 = vld [vmem:[%s1579_s1 + $0xd8] sm:$0xff]  ;;  %s186_s14 = scalar_lea.vmem %s1581_s3, %s1284_s23 }
   0xf   : > { %1025 = vmatpush3.msra.mxu0 %v204_v1  ;;  %1054 = vmatprep.mubr.f32.mxu0 %v188_v7  ;;  %v300_v11 = vld [vmem:[%s1579_s1 + $0xe0] sm:$0xff]  ;;  %v197_v14 = vld [vmem:[%s1579_s1 + $0x38] sm:$0xff]  ;;  %v298_v15 = vld [vmem:[%s1579_s1 + $0xd0] sm:$0xff] }
  0x10   : > { %1026 = vmatprep.subr.mxu0 %v203_v2  ;;  %1059 = vmatprep.subr.mxu1 %v302_v6  ;;  %v198_v12 = vld [vmem:[%s1579_s1 + $0x40] sm:$0xff]  ;;  %v196_v16 = vld [vmem:[%s1579_s1 + $0x30] sm:$0xff]  ;;  %v297_v17 = vld [vmem:[%s1579_s1 + $0xc8] sm:$0xff] }
  0x11   : > { %1027 = vmatpush3.msra.mxu0 %v203_v2  ;;  %1060 = vmatpush3.msra.mxu1 %v302_v6  ;;  %v195_v18 = vld [vmem:[%s1579_s1 + $0x28] sm:$0xff]  ;;  %v296_v19 = vld [vmem:[%s1579_s1 + $0xc0] sm:$0xff]  ;;  %v295_v21 = vld [vmem:[%s1579_s1 + $0xb8] sm:$0xff] }
  0x12   : > { %1028 = vmatprep.subr.mxu0 %v202_v3  ;;  %1061 = vmatprep.subr.mxu1 %v301_v9  ;;  %v194_v20 = vld [vmem:[%s1579_s1 + $0x20] sm:$0xff]  ;;  %v193_v22 = vld [vmem:[%s1579_s1 + $0x18] sm:$0xff]  ;;  %v294_v23 = vld [vmem:[%s1579_s1 + $0xb0] sm:$0xff] }
  0x13   : > { %1029 = vmatpush3.msra.mxu0 %v202_v3  ;;  %1062 = vmatpush3.msra.mxu1 %v301_v9  ;;  %v192_v24 = vld [vmem:[%s1579_s1 + $0x10] sm:$0xff]  ;;  %v293_v25 = vld [vmem:[%s1579_s1 + $0xa8] sm:$0xff]  ;;  %v292_v27 = vld [vmem:[%s1579_s1 + $0xa0] sm:$0xff] }
  0x14   : > { %1030 = vmatprep.subr.mxu0 %v201_v5  ;;  %1063 = vmatprep.subr.mxu1 %v300_v11  ;;  %v191_v26 = vld [vmem:[%s1579_s1 + $0x8] sm:$0xff]  ;;  %v190_v28 = vld [vmem:[%s1579_s1] sm:$0xff]  ;;  %v291_v30 = vld [vmem:[%s1579_s1 + $0x98] sm:$0xff] }
  0x15   : > { %1031 = vmatpush3.msra.mxu0 %v201_v5  ;;  %1064 = vmatpush3.msra.mxu1 %v300_v11  ;;  %v189_v29 = vld [vmem:[%s1296_s30 + $0x8] sm:$0xff]  ;;  %v290_v31 = vld [vmem:[%s1579_s1 + $0x90] sm:$0xff]  ;;  %v288_v33 = vld [vmem:[%s1579_s1 + $0x80] sm:$0xff] }
  0x16   : > { %1032 = vmatprep.subr.mxu0 %v200_v8  ;;  %1065 = vmatprep.subr.mxu1 %v299_v13  ;;  %v289_v32 = vld [vmem:[%s1579_s1 + $0x88] sm:$0xff]  ;;  %v401_v34 = vld [vmem:[%s1579_s1 + $0x178] sm:$0xff]  ;;  %v400_v35 = vld [vmem:[%s1579_s1 + $0x170] sm:$0xff] }
  0x17   : > { %1033 = vmatpush3.msra.mxu0 %v200_v8  ;;  %1066 = vmatpush3.msra.mxu1 %v299_v13  ;;  %v399_v36 = vld [vmem:[%s1579_s1 + $0x168] sm:$0xff]  ;;  %v398_v37 = vld [vmem:[%s1579_s1 + $0x160] sm:$0xff]  ;;  %v397_v38 = vld [vmem:[%s1579_s1 + $0x158] sm:$0xff] }
  0x18   : > { %1034 = vmatprep.subr.mxu0 %v199_v10  ;;  %1067 = vmatprep.subr.mxu1 %v298_v15  ;;  %v396_v39 = vld [vmem:[%s1579_s1 + $0x150] sm:$0xff]  ;;  %v395_v40 = vld [vmem:[%s1579_s1 + $0x148] sm:$0xff]  ;;  %v394_v41 = vld [vmem:[%s1579_s1 + $0x140] sm:$0xff] }
  0x19   : > { %1035 = vmatpush3.msra.mxu0 %v199_v10  ;;  %1068 = vmatpush3.msra.mxu1 %v298_v15  ;;  %v393_v42 = vld [vmem:[%s1579_s1 + $0x138] sm:$0xff]  ;;  %v392_v43 = vld [vmem:[%s1579_s1 + $0x130] sm:$0xff]  ;;  %v391_v44 = vld [vmem:[%s1579_s1 + $0x128] sm:$0xff] }
  0x1a   : > { %1036 = vmatprep.subr.mxu0 %v198_v12  ;;  %1069 = vmatprep.subr.mxu1 %v297_v17  ;;  %v390_v45 = vld [vmem:[%s1579_s1 + $0x120] sm:$0xff]  ;;  %v389_v53 = vld [vmem:[%s1579_s1 + $0x118] sm:$0xff]  ;;  %v388_v54 = vld [vmem:[%s1579_s1 + $0x110] sm:$0xff] }
  0x1b   : > { %1037 = vmatpush3.msra.mxu0 %v198_v12  ;;  %1070 = vmatpush3.msra.mxu1 %v297_v17  ;;  %v911_v46 = vld [vmem:[%s1579_s1 + $0x300] ss:$0 sm:$0xff]  ;;  %v387_v55 = vld [vmem:[%s1579_s1 + $0x108] sm:$0xff]  ;;  %v494_v57 = vld [vmem:[%s1579_s1 + $0x1b8] sm:$0xff] }
  0x1c   : > { %1038 = vmatprep.subr.mxu0 %v197_v14  ;;  %1071 = vmatprep.subr.mxu1 %v296_v19  ;;  %v386_v56 = vld [vmem:[%s1579_s1 + $0x100] sm:$0xff]  ;;  %v493_v58 = vld [vmem:[%s1579_s1 + $0x1b0] sm:$0xff]  ;;  %v492_v59 = vld [vmem:[%s1579_s1 + $0x1a8] sm:$0xff] }
  0x1d   : > { %1039 = vmatpush3.msra.mxu0 %v197_v14  ;;  %1072 = vmatpush3.msra.mxu1 %v296_v19  ;;  %v491_v60 = vld [vmem:[%s1579_s1 + $0x1a0] sm:$0xff]  ;;  %v490_v4 = vld [vmem:[%s1579_s1 + $0x198] sm:$0xff]  ;;  %v489_v5 = vld [vmem:[%s1579_s1 + $0x190] sm:$0xff] }
  0x1e   : > { %1040 = vmatprep.subr.mxu0 %v196_v16  ;;  %1073 = vmatprep.subr.mxu1 %v295_v21  ;;  %v912_v61 = vld [vmem:[%s1579_s1 + $0x301] ss:$0 sm:$0xff]  ;;  %v488_v6 = vld [vmem:[%s1579_s1 + $0x188] sm:$0xff]  ;;  %v604_v8 = vld [vmem:[%s1579_s1 + $0x278] sm:$0xff] }
  0x1f   : > { %1041 = vmatpush3.msra.mxu0 %v196_v16  ;;  %1074 = vmatpush3.msra.mxu1 %v295_v21  ;;  %v487_v7 = vld [vmem:[%s1579_s1 + $0x180] sm:$0xff]  ;;  %v603_v16 = vld [vmem:[%s1579_s1 + $0x270] sm:$0xff]  ;;  %v602_v17 = vld [vmem:[%s1579_s1 + $0x268] sm:$0xff] }
  0x20   : > { %1042 = vmatprep.subr.mxu0 %v195_v18  ;;  %1075 = vmatprep.subr.mxu1 %v294_v23  ;;  %v913_v9 = vld [vmem:[%s1579_s1 + $0x302] ss:$0 sm:$0xff]  ;;  %v600_v19 = vld [vmem:[%s1579_s1 + $0x258] sm:$0xff]  ;;  %v598_v21 = vld [vmem:[%s1579_s1 + $0x248] sm:$0xff] }
  0x21   : > { %1043 = vmatpush3.msra.mxu0 %v195_v18  ;;  %1076 = vmatpush3.msra.mxu1 %v294_v23  ;;  %v601_v18 = vld [vmem:[%s1579_s1 + $0x260] sm:$0xff]  ;;  %v596_v23 = vld [vmem:[%s1579_s1 + $0x238] sm:$0xff] }
  0x22   : > { %1044 = vmatprep.subr.mxu0 %v194_v20  ;;  %1077 = vmatprep.subr.mxu1 %v293_v25 }
  0x23   : > { %1045 = vmatpush3.msra.mxu0 %v194_v20  ;;  %1078 = vmatpush3.msra.mxu1 %v293_v25  ;;  %v599_v20 = vld [vmem:[%s1579_s1 + $0x250] sm:$0xff]  ;;  %v594_v25 = vld [vmem:[%s1579_s1 + $0x228] sm:$0xff] }
  0x24   : > { %1046 = vmatprep.subr.mxu0 %v193_v22  ;;  %1079 = vmatprep.subr.mxu1 %v292_v27 }
  0x25   : > { %1047 = vmatpush3.msra.mxu0 %v193_v22  ;;  %1080 = vmatpush3.msra.mxu1 %v292_v27  ;;  %v597_v22 = vld [vmem:[%s1579_s1 + $0x240] sm:$0xff]  ;;  %v592_v27 = vld [vmem:[%s1579_s1 + $0x218] sm:$0xff] }
  0x26   : > { %1048 = vmatprep.subr.mxu0 %v192_v24  ;;  %1081 = vmatprep.subr.mxu1 %v291_v30 }
  0x27   : > { %1049 = vmatpush3.msra.mxu0 %v192_v24  ;;  %1082 = vmatpush3.msra.mxu1 %v291_v30  ;;  %v595_v24 = vld [vmem:[%s1579_s1 + $0x230] sm:$0xff]  ;;  %v589_v30 = vld [vmem:[%s1579_s1 + $0x200] sm:$0xff] }
  0x28   : > { %1050 = vmatprep.subr.mxu0 %v191_v26  ;;  %1083 = vmatprep.subr.mxu1 %v290_v31 }
  0x29   : > { %1051 = vmatpush3.msra.mxu0 %v191_v26  ;;  %1084 = vmatpush3.msra.mxu1 %v290_v31  ;;  %v593_v26 = vld [vmem:[%s1579_s1 + $0x220] sm:$0xff]  ;;  %v708_v31 = vld [vmem:[%s1579_s1 + $0x2f8] sm:$0xff] }
  0x2a   : > { %1052 = vmatprep.subr.mxu0 %v190_v28  ;;  %1085 = vmatprep.subr.mxu1 %v289_v32 }
  0x2b   : > { %1053 = vmatpush3.msra.mxu0 %v190_v28  ;;  %1086 = vmatpush3.msra.mxu1 %v289_v32  ;;  %v591_v28 = vld [vmem:[%s1579_s1 + $0x210] sm:$0xff] }
  0x2c   : > { %1055 = vmatmul.mubr.f32.vlgmr.msra.gmra.mxu0 %v189_v29  ;;  %1087 = vmatprep.subr.mxu1 %v288_v33  ;;  %v590_v29 = vld [vmem:[%s1579_s1 + $0x208] sm:$0xff]  ;;  %v707_v32 = vld [vmem:[%s1579_s1 + $0x2f0] sm:$0xff] }
  0x2d   : > { %1088 = vmatpush3.msra.mxu1 %v288_v33  ;;  %1092 = vmatprep.subr.mxu0 %v401_v34  ;;  %v706_v33 = vld [vmem:[%s1579_s1 + $0x2e8] sm:$0xff] }
  0x2e   : > { %1093 = vmatpush3.msra.mxu0 %v401_v34  ;;  %1127 = vmatprep.subr.mxu1 %v494_v57  ;;  %v914_v34 = vld [vmem:[%s1579_s1 + $0x303] ss:$0 sm:$0xff] }
  0x2f   : > { %1094 = vmatprep.subr.mxu0 %v400_v35 }
  0x30   : > { %1095 = vmatpush3.msra.mxu0 %v400_v35 }
  0x31   : > { %1096 = vmatprep.subr.mxu0 %v399_v36 }
  0x32   : > { %1097 = vmatpush3.msra.mxu0 %v399_v36 }
  0x33   : > { %1098 = vmatprep.subr.mxu0 %v398_v37 }
  0x34   : > { %1099 = vmatpush3.msra.mxu0 %v398_v37 }
  0x35   : > { %1100 = vmatprep.subr.mxu0 %v397_v38 }
  0x36   : > { %1101 = vmatpush3.msra.mxu0 %v397_v38 }
  0x37   : > { %1102 = vmatprep.subr.mxu0 %v396_v39 }
  0x38   : > { %1103 = vmatpush3.msra.mxu0 %v396_v39 }
  0x39   : > { %1104 = vmatprep.subr.mxu0 %v395_v40 }
  0x3a   : > { %1105 = vmatpush3.msra.mxu0 %v395_v40 }
  0x3b   : > { %1106 = vmatprep.subr.mxu0 %v394_v41 }
  0x3c   : > { %1107 = vmatpush3.msra.mxu0 %v394_v41 }
  0x3d   : > { %1108 = vmatprep.subr.mxu0 %v393_v42 }
  0x3e   : > { %1109 = vmatpush3.msra.mxu0 %v393_v42 }
  0x3f   : > { %1110 = vmatprep.subr.mxu0 %v392_v43 }
  0x40   : > { %1111 = vmatpush3.msra.mxu0 %v392_v43 }
  0x41   : > { %1112 = vmatprep.subr.mxu0 %v391_v44 }
  0x42   : > { %1113 = vmatpush3.msra.mxu0 %v391_v44 }
  0x43   : > { %1114 = vmatprep.subr.mxu0 %v390_v45 }
  0x44   : > { %1115 = vmatpush3.msra.mxu0 %v390_v45 }
  0x45   : > { %1116 = vmatprep.subr.mxu0 %v389_v53 }
  0x46   : > { %1117 = vmatpush3.msra.mxu0 %v389_v53  ;;  %v699_v53 = vld [vmem:[%s1579_s1 + $0x2b0] sm:$0xff] }
  0x47   : > { %1118 = vmatprep.subr.mxu0 %v388_v54 }
  0x48   : > { %1119 = vmatpush3.msra.mxu0 %v388_v54  ;;  %v698_v54 = vld [vmem:[%s1579_s1 + $0x2a8] sm:$0xff] }
  0x49   : > { %1120 = vmatprep.subr.mxu0 %v387_v55 }
  0x4a   : > { %1121 = vmatpush3.msra.mxu0 %v387_v55  ;;  %v697_v55 = vld [vmem:[%s1579_s1 + $0x2a0] sm:$0xff] }
  0x4b   : > { %1122 = vmatprep.subr.mxu0 %v386_v56 }
  0x4c   : > { %1123 = vmatpush3.msra.mxu0 %v386_v56  ;;  %v696_v56 = vld [vmem:[%s1579_s1 + $0x298] sm:$0xff] }
  0x4d   : > { %1181 = vmatprep.subr.mxu0 %v708_v31 }
  0xec   : > { %v1056_v47 = vpop.f32.mrf.mxu0 }
  0xed   : > { %v283_v48 = vadd.f32 %v1056_v47, %v911_v46  ;;  %v705_v47 = vld [vmem:[%s1579_s1 + $0x2e0] sm:$0xff] }
  0xee   : > { %v277_v49 = vpop.f32.mrf.mxu0 }
  0xef   : > { %v278_v50 = vadd.f32 %v911_v46, %v277_v49  ;;  %v287_v52 = vmax.f32 %v283_v48, 0.0  ;;  %v704_v48 = vld [vmem:[%s1579_s1 + $0x2d8] sm:$0xff]  ;;  %v703_v49 = vld [vmem:[%s1579_s1 + $0x2d0] sm:$0xff] }
  0xf1   : > { %v286_v51 = vmax.f32 %v278_v50, 0.0  ;;  %v702_v50 = vld [vmem:[%s1579_s1 + $0x2c8] sm:$0xff] }
  0xf3   : > { %1089 = vmatprep.mubr.f32.mxu1 %v286_v51  ;;  %v701_v51 = vld [vmem:[%s1579_s1 + $0x2c0] sm:$0xff] }
  0xf4   : > { %1090 = vmatmul.mubr.f32.vlgmr.msra.gmra.mxu1 %v287_v52  ;;  %v700_v52 = vld [vmem:[%s1579_s1 + $0x2b8] sm:$0xff] }
  0xf5   : > { %1128 = vmatpush3.msra.mxu1 %v494_v57  ;;  %v695_v57 = vld [vmem:[%s1579_s1 + $0x290] sm:$0xff] }
  0xf6   : > { %1129 = vmatprep.subr.mxu1 %v493_v58 }
  0xf7   : > { %1130 = vmatpush3.msra.mxu1 %v493_v58  ;;  %v694_v58 = vld [vmem:[%s1579_s1 + $0x288] sm:$0xff] }
  0xf8   : > { %1131 = vmatprep.subr.mxu1 %v492_v59 }
  0xf9   : > { %1132 = vmatpush3.msra.mxu1 %v492_v59  ;;  %v693_v59 = vld [vmem:[%s1579_s1 + $0x280] sm:$0xff] }
  0xfa   : > { %1133 = vmatprep.subr.mxu1 %v491_v60 }
  0xfb   : > { %1134 = vmatpush3.msra.mxu1 %v491_v60  ;;  %v917_v60 = vld [vmem:[%s1579_s1 + $0x304] ss:$0 sm:$0xff] }
  0xfc   : > { %1135 = vmatprep.subr.mxu1 %v490_v4 }
  0xfd   : > { %1136 = vmatpush3.msra.mxu1 %v490_v4 }
  0xfe   : > { %1137 = vmatprep.subr.mxu1 %v489_v5 }
  0xff   : > { %1138 = vmatpush3.msra.mxu1 %v489_v5 }
 0x100   : > { %1139 = vmatprep.subr.mxu1 %v488_v6 }
 0x101   : > { %1140 = vmatpush3.msra.mxu1 %v488_v6 }
 0x102   : > { %1141 = vmatprep.subr.mxu1 %v487_v7 }
 0x103   : > { %1142 = vmatpush3.msra.mxu1 %v487_v7 }
 0x104   : > { %1146 = vmatprep.subr.mxu1 %v604_v8 }
 0x1b4   : > { %v1091_v62 = vpop.f32.mrf.mxu1 }
 0x1b5   : > { %v381_v63 = vadd.f32 %v1091_v62, %v912_v61 }
 0x1b6   : > { %v375_v0 = vpop.f32.mrf.mxu1 }
 0x1b7   : > { %v376_v1 = vadd.f32 %v912_v61, %v375_v0  ;;  %v385_v3 = vmax.f32 %v381_v63, 0.0 }
 0x1b9   : > { %v384_v2 = vmax.f32 %v376_v1, 0.0 }
 0x1bb   : > { %1124 = vmatprep.mubr.f32.mxu0 %v384_v2 }
 0x1bc   : > { %1125 = vmatmul.mubr.f32.vlgmr.msra.gmra.mxu0 %v385_v3 }
 0x1bd   : > { %1182 = vmatpush3.msra.mxu0 %v708_v31 }
 0x1be   : > { %1183 = vmatprep.subr.mxu0 %v707_v32 }
 0x1bf   : > { %1184 = vmatpush3.msra.mxu0 %v707_v32 }
 0x1c0   : > { %1185 = vmatprep.subr.mxu0 %v706_v33 }
 0x1c1   : > { %1186 = vmatpush3.msra.mxu0 %v706_v33 }
 0x1c2   : > { %1187 = vmatprep.subr.mxu0 %v705_v47 }
 0x1c3   : > { %1188 = vmatpush3.msra.mxu0 %v705_v47 }
 0x1c4   : > { %1189 = vmatprep.subr.mxu0 %v704_v48 }
 0x1c5   : > { %1190 = vmatpush3.msra.mxu0 %v704_v48 }
 0x1c6   : > { %1191 = vmatprep.subr.mxu0 %v703_v49 }
 0x1c7   : > { %1192 = vmatpush3.msra.mxu0 %v703_v49 }
 0x1c8   : > { %1193 = vmatprep.subr.mxu0 %v702_v50 }
 0x1c9   : > { %1194 = vmatpush3.msra.mxu0 %v702_v50 }
 0x1ca   : > { %1195 = vmatprep.subr.mxu0 %v701_v51 }
 0x1cb   : > { %1196 = vmatpush3.msra.mxu0 %v701_v51 }
 0x1cc   : > { %1197 = vmatprep.subr.mxu0 %v700_v52 }
 0x1cd   : > { %1198 = vmatpush3.msra.mxu0 %v700_v52 }
 0x1ce   : > { %1199 = vmatprep.subr.mxu0 %v699_v53 }
 0x1cf   : > { %1200 = vmatpush3.msra.mxu0 %v699_v53 }
 0x1d0   : > { %1201 = vmatprep.subr.mxu0 %v698_v54 }
 0x1d1   : > { %1202 = vmatpush3.msra.mxu0 %v698_v54 }
 0x1d2   : > { %1203 = vmatprep.subr.mxu0 %v697_v55 }
 0x1d3   : > { %1204 = vmatpush3.msra.mxu0 %v697_v55 }
 0x1d4   : > { %1205 = vmatprep.subr.mxu0 %v696_v56 }
 0x1d5   : > { %1206 = vmatpush3.msra.mxu0 %v696_v56 }
 0x1d6   : > { %1207 = vmatprep.subr.mxu0 %v695_v57 }
 0x1d7   : > { %1208 = vmatpush3.msra.mxu0 %v695_v57 }
 0x1d8   : > { %1209 = vmatprep.subr.mxu0 %v694_v58 }
 0x1d9   : > { %1210 = vmatpush3.msra.mxu0 %v694_v58 }
 0x1da   : > { %1211 = vmatprep.subr.mxu0 %v693_v59 }
 0x1db   : > { %1212 = vmatpush3.msra.mxu0 %v693_v59 }
 0x27c   : > { %v1126_v10 = vpop.f32.mrf.mxu0 }
 0x27d   : > { %v479_v11 = vadd.f32 %v1126_v10, %v913_v9 }
 0x27e   : > { %v473_v12 = vpop.f32.mrf.mxu0 }
 0x27f   : > { %v474_v13 = vadd.f32 %v913_v9, %v473_v12  ;;  %v483_v15 = vmax.f32 %v479_v11, 0.0  ;;  %v918_v9 = vld [vmem:[%s1579_s1 + $0x305] ss:$0 sm:$0xff] }
 0x281   : > { %v482_v14 = vmax.f32 %v474_v13, 0.0  ;;  %486 = vst.msk [vmem:[%s180_s16 + $0x8] sm:$0xff] %vm484_vm0, %v483_v15 }
 0x283   : > { %485 = vst.msk [vmem:[%s180_s16] sm:$0xff] %vm484_vm0, %v482_v14  ;;  %1143 = vmatprep.mubr.msk.f32.mxu1 %vm484_vm0, %v482_v14 }
 0x284   : > { %1144 = vmatmul.mubr.msk.f32.vlgmr.msra.gmra.mxu1 %vm484_vm0, %v483_v15 }
 0x285   : > { %1147 = vmatpush3.msra.mxu1 %v604_v8 }
 0x286   : > { %1148 = vmatprep.subr.mxu1 %v603_v16 }
 0x287   : > { %1149 = vmatpush3.msra.mxu1 %v603_v16 }
 0x288   : > { %1150 = vmatprep.subr.mxu1 %v602_v17 }
 0x289   : > { %1151 = vmatpush3.msra.mxu1 %v602_v17 }
 0x28a   : > { %1152 = vmatprep.subr.mxu1 %v601_v18 }
 0x28b   : > { %1153 = vmatpush3.msra.mxu1 %v601_v18 }
 0x28c   : > { %1154 = vmatprep.subr.mxu1 %v600_v19 }
 0x28d   : > { %1155 = vmatpush3.msra.mxu1 %v600_v19 }
 0x28e   : > { %1156 = vmatprep.subr.mxu1 %v599_v20 }
 0x28f   : > { %1157 = vmatpush3.msra.mxu1 %v599_v20 }
 0x290   : > { %1158 = vmatprep.subr.mxu1 %v598_v21 }
 0x291   : > { %1159 = vmatpush3.msra.mxu1 %v598_v21  ;;  %v919_v21 = vld [vmem:[%s1579_s1 + $0x306] ss:$0 sm:$0xff] }
 0x292   : > { %1160 = vmatprep.subr.mxu1 %v597_v22 }
 0x293   : > { %1161 = vmatpush3.msra.mxu1 %v597_v22 }
 0x294   : > { %1162 = vmatprep.subr.mxu1 %v596_v23 }
 0x295   : > { %1163 = vmatpush3.msra.mxu1 %v596_v23 }
 0x296   : > { %1164 = vmatprep.subr.mxu1 %v595_v24 }
 0x297   : > { %1165 = vmatpush3.msra.mxu1 %v595_v24 }
 0x298   : > { %1166 = vmatprep.subr.mxu1 %v594_v25 }
 0x299   : > { %1167 = vmatpush3.msra.mxu1 %v594_v25 }
 0x29a   : > { %1168 = vmatprep.subr.mxu1 %v593_v26 }
 0x29b   : > { %1169 = vmatpush3.msra.mxu1 %v593_v26 }
 0x29c   : > { %1170 = vmatprep.subr.mxu1 %v592_v27 }
 0x29d   : > { %1171 = vmatpush3.msra.mxu1 %v592_v27 }
 0x29e   : > { %1172 = vmatprep.subr.mxu1 %v591_v28 }
 0x29f   : > { %1173 = vmatpush3.msra.mxu1 %v591_v28 }
 0x2a0   : > { %1174 = vmatprep.subr.mxu1 %v590_v29 }
 0x2a1   : > { %1175 = vmatpush3.msra.mxu1 %v590_v29 }
 0x2a2   : > { %1176 = vmatprep.subr.mxu1 %v589_v30 }
 0x2a3   : > { %1177 = vmatpush3.msra.mxu1 %v589_v30 }
 0x344   : > { %v1145_v35 = vpop.f32.mrf.mxu1 }
 0x345   : > { %v578_v36 = vadd.f32 %v1145_v35, %v914_v34 }
 0x346   : > { %v572_v37 = vpop.f32.mrf.mxu1 }
 0x347   : > { %v582_v38 = vmul.f32 0.5, %v578_v36  ;;  %v573_v39 = vadd.f32 %v914_v34, %v572_v37 }
 0x349   : > { %1224 = vtanh.f32 %v582_v38  ;;  %v581_v40 = vmul.f32 0.5, %v573_v39 }
 0x34b   : > { %1226 = vtanh.f32 %v581_v40 }
 0x356   : > { %v1225_v41 = vpop.eup %1224 }
 0x357   : > { %v586_v43 = vmul.f32 0.5, %v1225_v41 }
 0x358   : > { %v1227_v42 = vpop.eup %1226 }
 0x359   : > { %v585_v44 = vmul.f32 0.5, %v1227_v42  ;;  %v588_v46 = vadd.f32 0.5, %v586_v43 }
 0x35b   : > { %v587_v45 = vadd.f32 0.5, %v585_v44 }
 0x35d   : > { %1178 = vmatprep.mubr.f32.mxu1 %v587_v45 }
 0x35e   : > { %1179 = vmatmul.mubr.f32.vlgmr.msra.gmra.mxu1 %v588_v46 }
 0x41e   : > { %v1180_v61 = vpop.f32.mrf.mxu1 }
 0x41f   : > { %v682_v62 = vadd.f32 %v1180_v61, %v917_v60 }
 0x420   : > { %v676_v63 = vpop.f32.mrf.mxu1 }
 0x421   : > { %v686_v0 = vmul.f32 0.5, %v682_v62  ;;  %v677_v1 = vadd.f32 %v917_v60, %v676_v63 }
 0x423   : > { %1228 = vtanh.f32 %v686_v0  ;;  %v685_v2 = vmul.f32 0.5, %v677_v1 }
 0x425   : > { %1230 = vtanh.f32 %v685_v2 }
 0x430   : > { %v1229_v3 = vpop.eup %1228 }
 0x431   : > { %v690_v5 = vmul.f32 0.5, %v1229_v3 }
 0x432   : > { %v1231_v4 = vpop.eup %1230 }
 0x433   : > { %v689_v6 = vmul.f32 0.5, %v1231_v4  ;;  %v692_v8 = vadd.f32 0.5, %v690_v5 }
 0x435   : > { %v691_v7 = vadd.f32 0.5, %v689_v6 }
 0x437   : > { %1213 = vmatprep.mubr.f32.mxu0 %v691_v7 }
 0x438   : > { %1214 = vmatmul.mubr.f32.vlgmr.msra.gmra.mxu0 %v692_v8 }
 0x4f8   : > { %v1215_v10 = vpop.f32.mrf.mxu0 }
 0x4f9   : > { %v786_v11 = vadd.f32 %v1215_v10, %v918_v9 }
 0x4fa   : > { %v780_v12 = vpop.f32.mrf.mxu0 }
 0x4fb   : > { %v791_v13 = vmul.f32 0.5, %v786_v11  ;;  %v781_v14 = vadd.f32 %v918_v9, %v780_v12 }
 0x4fd   : > { %1232 = vtanh.f32 %v791_v13  ;;  %v790_v15 = vmul.f32 0.5, %v781_v14 }
 0x4ff   : > { %1234 = vtanh.f32 %v790_v15 }
 0x50a   : > { %v1233_v16 = vpop.eup %1232 }
 0x50b   : > { %v795_v17 = vmul.f32 0.5, %v1233_v16 }
 0x50c   : > { %v1235_v18 = vpop.eup %1234 }
 0x50d   : > { %v797_v19 = vadd.f32 0.5, %v795_v17  ;;  %v794_v20 = vmul.f32 0.5, %v1235_v18 }
 0x50f   : > { %v799_v22 = vsub.f32 %v797_v19, %v786_v11  ;;  %v796_v23 = vadd.f32 0.5, %v794_v20 }
 0x511   : > { %v798_v24 = vsub.f32 %v796_v23, %v781_v14  ;;  %v805_v25 = vmul.f32 %v919_v21, %v799_v22 }
 0x513   : > { %v804_v26 = vmul.f32 %v919_v21, %v798_v24  ;;  %v807_v28 = vadd.f32 %v805_v25, %v786_v11 }
 0x515   : > { %v806_v27 = vadd.f32 %v804_v26, %v781_v14  ;;  %809 = vst [vmem:[%s186_s14 + $0x8] sm:$0xff] %v807_v28 }
 0x517   : > { %808 = vst [vmem:[%s186_s14] sm:$0xff] %v806_v27 }
 0x518 PF: > { %s14_s12 = sadd.s32 1, %s1242_s12  }
 0x519   : > { %p11_p4 = scmp.ge.s32.totalorder %s14_s12, 5  }
 0x51b   :  { %13 = sbr.rel (!%p11_p4) target bundleno = 1 (0x1), region = 70 }

</bundles_post_ra>
